<compile_context>
chip_gen: v7x
topology: tpu7x:2x2x1
jax: 0.10.0
libtpu: 0.0.40
codegen_flags: <defaults>
</compile_context>

<pallas_src>
import jax
import jax.numpy as jnp
from jax.experimental import pallas as pl
from jax.experimental.pallas import tpu as pltpu


# Conservative single-block budget (input block + output block + keep block).
# Even with the pipeline's double buffering this stays far under every
# generation's default scoped-VMEM limit (16/32/32 MiB on v5e/v6e/v7x).
_SINGLE_BLOCK_VMEM_BUDGET = 8 * 1024 * 1024


def _mask_mul_kernel(mask_ref, keep_ref, o_ref):
    # out = mask * keep with broadcasting.  Used for both
    #   lane-dense  (C, T*V)   * (1, T*V)    (single-block path) and
    #   frame-tiled (C, tt, V) * (1, tt, 1)  (large-T fallback).
    o_ref[...] = (mask_ref[...] * keep_ref[...]).astype(o_ref.dtype)


def _apply_frame_mask(mask, frame_keep, out_dtype, frames_per_block=None):
    """out_mask[c, t, v] = mask[c, t, v] * frame_keep[t], as a Pallas kernel."""
    C, T, V = mask.shape
    keep = frame_keep.astype(mask.dtype)  # cast the tiny vector, never the full tile

    in_bytes = jnp.dtype(mask.dtype).itemsize
    out_bytes = jnp.dtype(out_dtype).itemsize
    block_bytes = C * T * V * (in_bytes + out_bytes) + T * V * in_bytes
    single_block = (
        (frames_per_block is None or frames_per_block >= T)
        and block_bytes <= _SINGLE_BLOCK_VMEM_BUDGET
    )

    if single_block:
        # ---- Single-step, lane-dense path (normal case for skeleton data) ----
        mask2d = mask.reshape(C, T * V)                    # contiguous, free
        keep2d = jnp.repeat(keep, V).reshape(1, T * V)     # pre-expanded keep vector
        out2d = pl.pallas_call(
            _mask_mul_kernel,
            out_shape=jax.ShapeDtypeStruct((C, T * V), out_dtype),
            grid_spec=pltpu.PrefetchScalarGridSpec(
                num_scalar_prefetch=0,
                grid=(1,),
                in_specs=[
                    # Blocks equal the full array dims -> (8,128) rule satisfied
                    # for any C, T, V without padding.
                    pl.BlockSpec((C, T * V), lambda i: (0, 0)),
                    pl.BlockSpec((1, T * V), lambda i: (0, 0)),
                ],
                out_specs=pl.BlockSpec((C, T * V), lambda i: (0, 0)),
            ),
        )(mask2d, keep2d)
        return out2d.reshape(C, T, V)

    # ---- Large-T fallback: tile the frame axis (VMEM guard, v7x-safe) ----
    frames = 1024 if frames_per_block is None else frames_per_block
    tt = max(8, (min(frames, T) // 8) * 8)   # frame tile, multiple of 8 (sublane rule)
    keep3d = keep.reshape(1, T, 1)
    return pl.pallas_call(
        _mask_mul_kernel,
        out_shape=jax.ShapeDtypeStruct((C, T, V), out_dtype),
        grid_spec=pltpu.PrefetchScalarGridSpec(
            num_scalar_prefetch=0,
            grid=(pl.cdiv(T, tt),),
            in_specs=[
                pl.BlockSpec((C, tt, V), lambda i: (0, i, 0)),
                pl.BlockSpec((1, tt, 1), lambda i: (0, i, 0)),
            ],
            out_specs=pl.BlockSpec((C, tt, V), lambda i: (0, i, 0)),
        ),
        compiler_params=pltpu.CompilerParams(
            # Independent T tiles -> even split across v7x's two TensorCores.
            dimension_semantics=("parallel",),
        ),
    )(mask, keep3d)


def make_frame_keep(key, T, low=None, high=None, dtype=jnp.float32):
    """Per-frame keep vector: 0 at the k randomly masked frames, 1 elsewhere."""
    low_eff = 0 if low is None else max(0, low)
    high_eff = T if high is None else min(high, T)

    k_key, p_key = jax.random.split(key)
    # k ~ randint(low, high + 1): inclusive upper bound, matching the original
    # np.random.randint(low, high + 1) in the PyTorch transform.
    n_masked = jax.random.randint(k_key, (), low_eff, high_eff + 1)
    # k distinct frames without replacement = first k slots of a permutation.
    perm = jax.random.permutation(p_key, T)
    slot_keep = (jnp.arange(T) >= n_masked).astype(dtype)   # slot i masked iff i < k
    return jnp.zeros((T,), dtype).at[perm].set(slot_keep)


def random_mask_frame_between(x, mask, key, low=None, high=None, frames_per_block=None):
    """JAX/Pallas equivalent of RandomMaskFrameBetween.forward: returns (x, out_mask)."""
    assert x.ndim == 3, "expected x of shape (C, T, V)"
    assert mask.shape == x.shape, "mask must have the same shape as x"
    C, T, V = x.shape

    # out_mask starts life as ones_like(x) -> keep x.dtype (no widening / extra HBM bytes).
    out_dtype = x.dtype
    frame_keep = make_frame_keep(key, T, low, high, jnp.float32)
    out_mask = _apply_frame_mask(mask, frame_keep, out_dtype, frames_per_block)
    return x, out_mask


if __name__ == "__main__":
    key = jax.random.PRNGKey(0)
    kx, km, kt, kx2, km2, kt2 = jax.random.split(key, 6)

    # --- Path 1: single-block lane-dense kernel (typical skeleton shapes) ---
    C, T, V = 3, 16, 25
    x = jax.random.normal(kx, (C, T, V), dtype=jnp.float32)
    mask = (jax.random.uniform(km, (C, T, V)) > 0.2).astype(jnp.float32)

    x_out, out_mask = random_mask_frame_between(x, mask, kt)
    out_mask = jax.block_until_ready(out_mask)

    frame_keep = make_frame_keep(kt, T, None, None, jnp.float32)
    ref = mask * frame_keep[None, :, None]      # ones_like(x) with masked frames zeroed, * mask
    assert out_mask.dtype == x.dtype, "out_mask must stay in x.dtype"
    assert jnp.allclose(out_mask, ref), "out_mask mismatch vs reference (single-block path)"
    assert jnp.array_equal(x_out, x), "x must pass through unchanged"
    assert jnp.all(out_mask * (1.0 - frame_keep)[None, :, None] == 0.0)

    # --- Path 2: frame-tiled fallback (VMEM guard), forced via frames_per_block ---
    C2, T2, V2 = 3, 64, 25
    x2 = jax.random.normal(kx2, (C2, T2, V2), dtype=jnp.float32)
    mask2 = (jax.random.uniform(km2, (C2, T2, V2)) > 0.2).astype(jnp.float32)

    x2_out, out_mask2 = random_mask_frame_between(x2, mask2, kt2, frames_per_block=16)
    out_mask2 = jax.block_until_ready(out_mask2)

    frame_keep2 = make_frame_keep(kt2, T2, None, None, jnp.float32)
    ref2 = mask2 * frame_keep2[None, :, None]
    assert jnp.allclose(out_mask2, ref2), "out_mask mismatch vs reference (tiled path)"
    assert jnp.array_equal(x2_out, x2), "x must pass through unchanged (tiled path)"

    print("KERNEL_OK")
</pallas_src>

<mosaic_0001>
module attributes {stable_mosaic.version = 11 : i64} {
  func.func @_mask_mul_kernel(%arg0: i32, %arg1: memref<3x400xf32, #tpu.memory_space<vmem>>, %arg2: memref<1x400xf32, #tpu.memory_space<vmem>>, %arg3: memref<3x400xf32, #tpu.memory_space<vmem>>) attributes {dimension_semantics = [#tpu.dimension_semantics<arbitrary>], iteration_bounds = array<i64: 1>, scalar_prefetch = 0 : i64, scratch_operands = 0 : i64, tpu.core_type = #tpu.core_type<tc>, window_params = [{pipeline_mode = #tpu.pipeline_mode<synchronous>, transform_indices = @transform_0, window_bounds = array<i64: 3, 400>}, {pipeline_mode = #tpu.pipeline_mode<synchronous>, transform_indices = @transform_1, window_bounds = array<i64: 1, 400>}, {pipeline_mode = #tpu.pipeline_mode<synchronous>, transform_indices = @transform_2, window_bounds = array<i64: 3, 400>}]} {
    %c0 = arith.constant 0 : index
    %c0_0 = arith.constant 0 : index
    %0 = vector.load %arg1[%c0, %c0_0] : memref<3x400xf32, #tpu.memory_space<vmem>>, vector<3x400xf32>
    %c0_1 = arith.constant 0 : index
    %c0_2 = arith.constant 0 : index
    %1 = vector.load %arg2[%c0_1, %c0_2] : memref<1x400xf32, #tpu.memory_space<vmem>>, vector<1x400xf32>
    %2 = vector.broadcast %1 : vector<1x400xf32> to vector<3x400xf32>
    %3 = arith.mulf %0, %2 : vector<3x400xf32>
    %c0_3 = arith.constant 0 : index
    %c0_4 = arith.constant 0 : index
    %4 = vector.load %arg3[%c0_3, %c0_4] : memref<3x400xf32, #tpu.memory_space<vmem>>, vector<3x400xf32>
    tpu.vector_store %arg3[%c0_3, %c0_4], %3 {strides = array<i32>} : memref<3x400xf32, #tpu.memory_space<vmem>>, vector<3x400xf32>,
    return
  }
  func.func @transform_0(%arg0: i32) -> (i32, i32) {
    %c0_i32 = arith.constant 0 : i32
    %c0_i32_0 = arith.constant 0 : i32
    %c0_i32_1 = arith.constant 0 : i32
    return %c0_i32, %c0_i32_0 : i32, i32
  }
  func.func @transform_1(%arg0: i32) -> (i32, i32) {
    %c0_i32 = arith.constant 0 : i32
    %c0_i32_0 = arith.constant 0 : i32
    %c0_i32_1 = arith.constant 0 : i32
    return %c0_i32, %c0_i32_0 : i32, i32
  }
  func.func @transform_2(%arg0: i32) -> (i32, i32) {
    %c0_i32 = arith.constant 0 : i32
    %c0_i32_0 = arith.constant 0 : i32
    %c0_i32_1 = arith.constant 0 : i32
    return %c0_i32, %c0_i32_0 : i32, i32
  }
}

</mosaic_0001>

<bundles_post_ra>
// kernel: tpu_custom_call.1
= control target key start
LH: loop header
LB: loop body
LE: loop exit
PB: predicated region body
PF: predicated region fallthrough
CT: control target
= control target key end

     0   :  { %7 = vsyncpa [#allocation3], 0  ;;  %s212_s0 = inlined_call_operand.hbm [shape: f32[3,400], index: 0, kind: input, shape index: {}]   ;;  %s213_s1 = inlined_call_operand.hbm [shape: f32[1,400], index: 1, kind: input, shape index: {}]   ;;  %s214_s2 = inlined_call_operand.hbm [shape: f32[3,400], index: 2, kind: output, shape index: {}]  }
   0x1   :  { %8 = vsyncpa [#allocation6], 0 }
   0x2   :  { %9 = vsyncpa [#allocation4], 0  ;;  %s158_s9 = smov [#allocation2]   ;;  %s159_s11 = smov [#allocation5]  }
   0x3   :  { %s16_s10 = sshll.u32 %s158_s9, 4  ;;  %s26_s12 = sshll.u32 %s159_s11, 4  ;;  %s17_s10 = int_to_ptr.vmem [resolvable:$true] %s16_s10  ;;  %s27_s12 = int_to_ptr.vmem [resolvable:$true] %s26_s12 }
   0x4   :  { %s86_s15 = scalar_lea.hbm %s212_s0, 256 }
   0x5   :  { %p87_p0 = scmp.ne.s32.totalorder %s212_s0, %s86_s15  ;;  %p90_p1 = scmp.lt.u32.totalorder %s86_s15, %s212_s0 }
   0x7   :  { %p92_p2 = pnand %p90_p1, %p87_p0 }
   0x9   :  { %95 = shalt.err (!%p92_p2)
}
   0xa   :  { %s96_s20 = scalar_lea.vmem %s17_s10, 256  ;;  %p101_p4 = scmp.lt.s32.totalorder %s17_s10, %s17_s10 }
   0xb   :  { %p97_p3 = scmp.ne.s32.totalorder %s17_s10, %s96_s20  ;;  %p102_p5 = scmp.lt.s32.totalorder %s96_s20, %s96_s20 }
   0xd   :  { %p103_p6 = por %p102_p5, %p101_p4 }
   0xf   :  { %p104_p7 = pnand %p103_p6, %p97_p3 }
  0x11   :  { %107 = shalt.err (!%p104_p7)
}
  0x12   :  { %19 = dma.hbm_to_vmem [thread:$0]  %s212_s0, 256, %s17_s10, [#allocation3]  }
  0x13   :  { %s108_s25 = scalar_lea.hbm %s213_s1, 64 }
  0x14   :  { %p109_p8 = scmp.ne.s32.totalorder %s213_s1, %s108_s25  ;;  %p112_p9 = scmp.lt.u32.totalorder %s108_s25, %s213_s1 }
  0x16   :  { %p114_p10 = pnand %p112_p9, %p109_p8 }
  0x18   :  { %117 = shalt.err (!%p114_p10)
}
  0x19   :  { %s118_s30 = scalar_lea.vmem %s27_s12, 64  ;;  %p123_p12 = scmp.lt.s32.totalorder %s27_s12, %s27_s12 }
  0x1a   :  { %p119_p11 = scmp.ne.s32.totalorder %s27_s12, %s118_s30  ;;  %p124_p13 = scmp.lt.s32.totalorder %s118_s30, %s118_s30 }
  0x1c   :  { %p125_p0 = por %p124_p13, %p123_p12 }
  0x1e   :  { %p126_p1 = pnand %p125_p0, %p119_p11 }
  0x20   :  { %129 = shalt.err (!%p126_p1)
}
  0x21   :  { %29 = dma.hbm_to_vmem [thread:$0]  %s213_s1, 64, %s27_s12, [#allocation6]  }
  0x22   :  { %152 = dma.done.wait [#allocation3], 256  }
  0x23   :  { %153 = vsyncadd [#allocation3], 4294967040 }
  0x24   :  { %154 = dma.done.wait [#allocation6], 64  }
  0x25   :  { %155 = vsyncadd [#allocation6], 4294967232  ;;  %v40_v0 = vlaneseq  ;;  %v38_v6 = vld [vmem:[#allocation5] sm:$0xf]  ;;  %vm63_vm0 = vcmask 1042432   ;;  %vm64_vm1 = vcmask 129028  }
  0x26   :  { %v36_v11 = vld [vmem:[#allocation2] sm:$0x77]  ;;  %v37_v12 = vld [vmem:[#allocation2 + $0x8] sm:$0x77]  ;;  %s160_s1 = smov [#allocation7]   ;;  %vm65_vm2 = vmor %vm64_vm1, %vm63_vm0 }
  0x27   :  { %v41_v1 = vshrl.u32 %v40_v0, 7  ;;  %s73_s4 = sshll.u32 %s160_s1, 4  ;;  %s74_s4 = int_to_ptr.vmem [resolvable:$true] %s73_s4 }
  0x28   :  { %s130_s5 = scalar_lea.vmem %s74_s4, 256  ;;  %p135_p3 = scmp.lt.s32.totalorder %s74_s4, %s74_s4 }
  0x29   :  { %v42_v2 = vsub.s32 0, %v41_v1  ;;  %v46_v3 = vsub.s32 1, %v41_v1  ;;  %v50_v4 = vsub.s32 2, %v41_v1  ;;  %v54_v5 = vsub.s32 3, %v41_v1  ;;  %p131_p2 = scmp.ne.s32.totalorder %s74_s4, %s130_s5  ;;  %p136_p4 = scmp.lt.s32.totalorder %s130_s5, %s130_s5 }
  0x2b   :  { %v43_v7 = vrot.slane %v38_v6, %v42_v2  ;;  %v47_v8 = vrot.slane %v38_v6, %v46_v3  ;;  %v51_v9 = vrot.slane %v38_v6, %v50_v4  ;;  %v55_v10 = vrot.slane %v38_v6, %v54_v5  ;;  %p137_p5 = por %p136_p4, %p135_p3 }
  0x2d   :  { %v56_v13 = vcombine.low %v43_v7, %v47_v8  ;;  %v57_v14 = vcombine.low %v51_v9, %v55_v10  ;;  %p138_p6 = pnand %p137_p5, %p131_p2 }
  0x2f   :  { %v60_v15 = vmul.f32 %v56_v13, %v36_v11  ;;  %v61_v16 = vmul.f32 %v57_v14, %v37_v12 }
  0x31   :  { %62 = vst [vmem:[#allocation7] sm:$0x77] %v60_v15  ;;  %66 = vst.msk [vmem:[#allocation7 + $0x8] sm:$0x77] %vm65_vm2, %v61_v16 }
  0x32   :  { %141 = shalt.err (!%p138_p6)
}
  0x33   :  { %s142_s8 = scalar_lea.hbm %s214_s2, 256 }
  0x34   :  { %p143_p7 = scmp.ne.s32.totalorder %s214_s2, %s142_s8  ;;  %p146_p8 = scmp.lt.u32.totalorder %s142_s8, %s214_s2 }
  0x36   :  { %p148_p9 = pnand %p146_p8, %p143_p7 }
  0x38   :  { %151 = shalt.err (!%p148_p9)
}
  0x39   :  { %76 = dma.vmem_to_hbm [thread:$0]  %s74_s4, 256, %s214_s2, [#allocation4]  }
  0x3a   :  { %156 = dma.done.wait [#allocation4], 256  }
  0x3b   :  { %157 = vsyncadd [#allocation4], 4294967040 }
  0x3c   :  { %80 = vsyncpa [#allocation3], 1 }
  0x3d   :  { %81 = vsyncpa [#allocation6], 1 }
  0x3e   :  { %82 = vsyncpa [#allocation4], 1 }

</bundles_post_ra>
